<compile_context>
chip_gen: v5e
topology: v5e:2x2
jax: 0.10.0
libtpu: 0.0.40
codegen_flags: <defaults>
</compile_context>

<pallas_src>
import math
import jax
import jax.numpy as jnp
from jax.experimental import pallas as pl
from jax.experimental.pallas import tpu as pltpu

_LANE = 128
_NEG_INF = -1e30


def _round_up(n, m):
    return (n + m - 1) // m * m


# ---------------------------------------------------------------------------
# Kernel: T fused decode steps (grid axis 0 = step, sequential / "arbitrary").
# ---------------------------------------------------------------------------
def _decode_kernel(tok_ref,            # SMEM (T,) int32 -- scalar prefetch
                   emb_ref,            # VMEM (V, Hp)      resident
                   h0_ref,             # VMEM (L, 1, Hp)   resident (initial hidden)
                   w_ref,              # VMEM (L, 2*Hp, Hp) fused [W_ih; W_hh], resident
                   b_ref,              # VMEM (L, 1, Hp)   fused b_ih + b_hh, resident
                   wout_ref,           # VMEM (Hp, Vp)     resident
                   bout_ref,           # VMEM (1, Vp)      resident (-1e30 on pad cols)
                   logp_ref,           # out block (1, 1, Vp) of (T, 1, Vp)
                   hout_ref):          # out (L, 1, Hp)    revisited -> running hidden state
    t = pl.program_id(0)
    n_layers = h0_ref.shape[0]

    # Initialize the running hidden state from the provided hidden on the first step.
    @pl.when(t == 0)
    def _():
        hout_ref[...] = h0_ref[...]

    # Fused embedding lookup (dropout is identity in eval mode).
    tok = tok_ref[t]
    x = emb_ref[pl.ds(tok, 1), :]                       # (1, Hp)

    # Stacked tanh-RNN layers, one fused matmul per layer: [x, h] @ [W_ih; W_hh] + b.
    for l in range(n_layers):                           # static unroll
        h_prev = hout_ref[l]                            # (1, Hp)
        xin = jnp.concatenate([x, h_prev], axis=-1)     # (1, 2*Hp)
        pre = jnp.dot(xin, w_ref[l], preferred_element_type=jnp.float32) + b_ref[l]
        h_new = jnp.tanh(pre)                           # nn.RNN default nonlinearity
        hout_ref[l] = h_new
        x = h_new                                       # inter-layer dropout = identity (eval)

    # Output projection + numerically stable LogSoftmax (pad columns carry -1e30 bias).
    logits = jnp.dot(x, wout_ref[...], preferred_element_type=jnp.float32) + bout_ref[...]
    m = jnp.max(logits, axis=-1, keepdims=True)
    z = logits - m
    lse = jnp.log(jnp.sum(jnp.exp(z), axis=-1, keepdims=True))
    logp_ref[0] = z - lse


# ---------------------------------------------------------------------------
# Wrappers
# ---------------------------------------------------------------------------
def decoder_rnn_decode(prepared, tokens, hidden):
    """Runs T DecoderCell forward steps fused in one pallas_call.

    tokens: (T,) int token ids, hidden: (L, 1, H) float32.
    Returns (log_probs (T, V), new_hidden (L, 1, H)).
    """
    tokens = jnp.asarray(tokens, jnp.int32)
    T = tokens.shape[0]
    L, H, V = prepared["L"], prepared["H"], prepared["V"]
    Hp, Vp = prepared["Hp"], prepared["Vp"]
    Vt = prepared["emb"].shape[0]

    h0 = jnp.zeros((L, 1, Hp), jnp.float32).at[:, :, :H].set(hidden.astype(jnp.float32))

    grid_spec = pltpu.PrefetchScalarGridSpec(
        num_scalar_prefetch=1,
        grid=(T,),
        in_specs=[
            pl.BlockSpec((Vt, Hp), lambda t, tok: (0, 0)),         # embedding (resident)
            pl.BlockSpec((L, 1, Hp), lambda t, tok: (0, 0, 0)),    # h0
            pl.BlockSpec((L, 2 * Hp, Hp), lambda t, tok: (0, 0, 0)),  # fused RNN weights
            pl.BlockSpec((L, 1, Hp), lambda t, tok: (0, 0, 0)),    # fused RNN bias
            pl.BlockSpec((Hp, Vp), lambda t, tok: (0, 0)),         # output projection
            pl.BlockSpec((1, Vp), lambda t, tok: (0, 0)),          # output bias
        ],
        out_specs=(
            pl.BlockSpec((1, 1, Vp), lambda t, tok: (t, 0, 0)),    # per-step log-probs
            pl.BlockSpec((L, 1, Hp), lambda t, tok: (0, 0, 0)),    # running hidden (resident)
        ),
    )

    logp, h_new = pl.pallas_call(
        _decode_kernel,
        out_shape=(
            jax.ShapeDtypeStruct((T, 1, Vp), jnp.float32),
            jax.ShapeDtypeStruct((L, 1, Hp), jnp.float32),
        ),
        grid_spec=grid_spec,
        compiler_params=pltpu.CompilerParams(dimension_semantics=("arbitrary",)),
    )(tokens, prepared["emb"], h0, prepared["w"], prepared["b"],
      prepared["w_out"], prepared["b_out"])

    return logp[:, 0, :V], h_new[:, :, :H]


def decoder_rnn_step(prepared, decoder_input, hidden):
    """Single DecoderRNN.forward step: returns (log_probs (1, V), hidden (L, 1, H))."""
    tokens = jnp.reshape(jnp.asarray(decoder_input, jnp.int32), (1,))
    logp, h_new = decoder_rnn_decode(prepared, tokens, hidden)
    return logp, h_new


# ---------------------------------------------------------------------------
# Parameter construction (torch-like shapes) and kernel-side preparation.
# ---------------------------------------------------------------------------
def init_params(key, output_size, hidden_size, n_layers):
    """Deterministic synthetic params mirroring the PyTorch module's shapes/inits."""
    V, H, L = output_size, hidden_size, n_layers
    k_emb, k_rnn, k_out = jax.random.split(key, 3)
    bound = 1.0 / math.sqrt(H)

    def uni(k, shape):
        return jax.random.uniform(k, shape, jnp.float32, -bound, bound)

    rnn_keys = jax.random.split(k_rnn, 4 * L)
    w_ih = jnp.stack([uni(rnn_keys[4 * l + 0], (H, H)) for l in range(L)])  # (L, in, out)
    w_hh = jnp.stack([uni(rnn_keys[4 * l + 1], (H, H)) for l in range(L)])
    b_ih = jnp.stack([uni(rnn_keys[4 * l + 2], (1, H)) for l in range(L)])
    b_hh = jnp.stack([uni(rnn_keys[4 * l + 3], (1, H)) for l in range(L)])

    k_ow, k_ob = jax.random.split(k_out)
    return {
        "embedding": jax.random.normal(k_emb, (V, H), jnp.float32),  # torch Embedding ~ N(0,1)
        "w_ih": w_ih, "w_hh": w_hh, "b_ih": b_ih, "b_hh": b_hh,
        "w_out": uni(k_ow, (H, V)),   # pre-transposed Linear(H, V) weight
        "b_out": uni(k_ob, (1, V)),
    }


def prepare_params(params):
    """Fuse per-layer weights and zero-pad everything to lane-dense (multiple-of-128) shapes."""
    emb = params["embedding"]
    w_ih, w_hh = params["w_ih"], params["w_hh"]
    b_fused = params["b_ih"] + params["b_hh"]
    w_out, b_out = params["w_out"], params["b_out"]

    V, H = emb.shape
    L = w_ih.shape[0]
    Hp, Vp = _round_up(H, _LANE), _round_up(V, _LANE)

    emb_p = jnp.zeros((V, Hp), jnp.float32).at[:, :H].set(emb)
    w = jnp.zeros((L, 2 * Hp, Hp), jnp.float32)
    w = w.at[:, :H, :H].set(w_ih).at[:, Hp:Hp + H, :H].set(w_hh)   # [x-rows ; h-rows]
    b = jnp.zeros((L, 1, Hp), jnp.float32).at[:, :, :H].set(b_fused)
    w_out_p = jnp.zeros((Hp, Vp), jnp.float32).at[:H, :V].set(w_out)
    b_out_p = jnp.full((1, Vp), _NEG_INF, jnp.float32).at[:, :V].set(b_out)

    return {"emb": emb_p, "w": w, "b": b, "w_out": w_out_p, "b_out": b_out_p,
            "L": L, "H": H, "V": V, "Hp": Hp, "Vp": Vp}


# ---------------------------------------------------------------------------
# Pure-JAX reference of the PyTorch forward (for validation only).
# ---------------------------------------------------------------------------
def reference_decode(params, tokens, hidden):
    def hdot(a, b):
        return jnp.dot(a, b, precision=jax.lax.Precision.HIGHEST)

    logps, h = [], hidden
    for tok in tokens:
        inp = params["embedding"][tok].reshape(1, -1)
        new_h = []
        for l in range(h.shape[0]):
            h_new = jnp.tanh(hdot(inp, params["w_ih"][l]) + params["b_ih"][l]
                             + hdot(h[l], params["w_hh"][l]) + params["b_hh"][l])
            new_h.append(h_new)
            inp = h_new
        h = jnp.stack(new_h)
        logits = hdot(inp, params["w_out"]) + params["b_out"]
        logps.append(jax.nn.log_softmax(logits, axis=1))
    return jnp.concatenate(logps, axis=0), h


if __name__ == "__main__":
    V, H, L, T = 64, 32, 2, 8     # vocab, hidden, layers, fused decode steps
    key = jax.random.PRNGKey(0)
    params = init_params(key, V, H, L)
    prepared = prepare_params(params)

    tokens = jax.random.randint(jax.random.PRNGKey(1), (T,), 0, V, dtype=jnp.int32)
    hidden = jax.random.normal(jax.random.PRNGKey(2), (L, 1, H), jnp.float32)

    # Fused multi-step decode (one pallas_call for all T steps).
    log_probs, new_hidden = decoder_rnn_decode(prepared, tokens, hidden)
    jax.block_until_ready((log_probs, new_hidden))

    # Single-step API (identical semantics to one DecoderRNN.forward call).
    logp1, h1 = decoder_rnn_step(prepared, tokens[0], hidden)
    jax.block_until_ready((logp1, h1))

    assert log_probs.shape == (T, V) and new_hidden.shape == (L, 1, H)
    assert logp1.shape == (1, V) and h1.shape == (L, 1, H)

    # Rows must be valid log-probabilities (pad columns excluded from normalization).
    assert float(jnp.max(jnp.abs(jnp.sum(jnp.exp(log_probs), axis=1) - 1.0))) < 1e-4

    # Match the plain-JAX reference of the PyTorch forward.
    ref_lp, ref_h = reference_decode(params, tokens, hidden)
    assert float(jnp.max(jnp.abs(log_probs - ref_lp))) < 1e-3
    assert float(jnp.max(jnp.abs(new_hidden - ref_h))) < 1e-3
    assert float(jnp.max(jnp.abs(logp1 - ref_lp[0:1]))) < 1e-3

    print("KERNEL_OK")
</pallas_src>

<mosaic_0001>
module attributes {stable_mosaic.version = 11 : i64} {
  func.func @_decode_kernel(%arg0: i32, %arg1: memref<8xi32, #tpu.memory_space<smem>>, %arg2: memref<64x128xf32, #tpu.memory_space<vmem>>, %arg3: memref<2x1x128xf32, #tpu.memory_space<vmem>>, %arg4: memref<2x256x128xf32, #tpu.memory_space<vmem>>, %arg5: memref<2x1x128xf32, #tpu.memory_space<vmem>>, %arg6: memref<128x128xf32, #tpu.memory_space<vmem>>, %arg7: memref<1x128xf32, #tpu.memory_space<vmem>>, %arg8: memref<1x1x128xf32, #tpu.memory_space<vmem>>, %arg9: memref<2x1x128xf32, #tpu.memory_space<vmem>>) attributes {dimension_semantics = [#tpu.dimension_semantics<arbitrary>], iteration_bounds = array<i64: 8>, scalar_prefetch = 1 : i64, scratch_operands = 0 : i64, tpu.core_type = #tpu.core_type<tc>, window_params = [{pipeline_mode = #tpu.pipeline_mode<synchronous>, transform_indices = @transform_0, window_bounds = array<i64: 64, 128>}, {pipeline_mode = #tpu.pipeline_mode<synchronous>, transform_indices = @transform_1, window_bounds = array<i64: 2, 1, 128>}, {pipeline_mode = #tpu.pipeline_mode<synchronous>, transform_indices = @transform_2, window_bounds = array<i64: 2, 256, 128>}, {pipeline_mode = #tpu.pipeline_mode<synchronous>, transform_indices = @transform_3, window_bounds = array<i64: 2, 1, 128>}, {pipeline_mode = #tpu.pipeline_mode<synchronous>, transform_indices = @transform_4, window_bounds = array<i64: 128, 128>}, {pipeline_mode = #tpu.pipeline_mode<synchronous>, transform_indices = @transform_5, window_bounds = array<i64: 1, 128>}, {transform_indices = @transform_6, window_bounds = array<i64: 1, 1, 128>}, {pipeline_mode = #tpu.pipeline_mode<synchronous>, transform_indices = @transform_7, window_bounds = array<i64: 2, 1, 128>}]} {
    %c0_i32 = arith.constant 0 : i32
    %0 = arith.cmpi eq, %arg0, %c0_i32 : i32
    %1 = arith.extui %0 : i1 to i32
    %c0_i32_0 = arith.constant 0 : i32
    %2 = arith.cmpi ne, %1, %c0_i32_0 : i32
    scf.if %2 {
      %c0_35 = arith.constant 0 : index
      %c0_36 = arith.constant 0 : index
      %c0_37 = arith.constant 0 : index
      %50 = vector.load %arg3[%c0_35, %c0_36, %c0_37] : memref<2x1x128xf32, #tpu.memory_space<vmem>>, vector<2x1x128xf32>
      %c0_38 = arith.constant 0 : index
      %c0_39 = arith.constant 0 : index
      %c0_40 = arith.constant 0 : index
      %51 = vector.load %arg9[%c0_38, %c0_39, %c0_40] : memref<2x1x128xf32, #tpu.memory_space<vmem>>, vector<2x1x128xf32>
      tpu.vector_store %arg9[%c0_38, %c0_39, %c0_40], %50 {strides = array<i32>} : memref<2x1x128xf32, #tpu.memory_space<vmem>>, vector<2x1x128xf32>,
    } else {
    }
    %3 = arith.index_cast %arg0 : i32 to index
    %4 = memref.load %arg1[%3] : memref<8xi32, #tpu.memory_space<smem>>
    %5 = arith.index_cast %4 : i32 to index
    %c0 = arith.constant 0 : index
    %6 = vector.load %arg2[%5, %c0] : memref<64x128xf32, #tpu.memory_space<vmem>>, vector<1x128xf32>
    %c0_1 = arith.constant 0 : index
    %c0_2 = arith.constant 0 : index
    %c0_3 = arith.constant 0 : index
    %7 = vector.load %arg9[%c0_1, %c0_2, %c0_3] : memref<2x1x128xf32, #tpu.memory_space<vmem>>, vector<1x1x128xf32>
    %8 = vector.shape_cast %7 : vector<1x1x128xf32> to vector<1x128xf32>
    %9 = tpu.concatenate %6, %8 in 1 : vector<1x128xf32>, vector<1x128xf32> -> vector<1x256xf32>
    %c0_4 = arith.constant 0 : index
    %c0_5 = arith.constant 0 : index
    %c0_6 = arith.constant 0 : index
    %10 = vector.load %arg4[%c0_4, %c0_5, %c0_6] : memref<2x256x128xf32, #tpu.memory_space<vmem>>, vector<1x256x128xf32>
    %11 = vector.shape_cast %10 : vector<1x256x128xf32> to vector<256x128xf32>
    %cst = arith.constant dense<0.000000e+00> : vector<1x128xf32>
    %12 = tpu.matmul %9, %11, %cst {dimension_numbers = #tpu.dot_dimension_numbers<[1], [0], [0], [1], [0, 0, 1, 1], [], []>} : vector<1x256xf32>, vector<256x128xf32>, vector<1x128xf32> -> vector<1x128xf32>
    %c0_7 = arith.constant 0 : index
    %c0_8 = arith.constant 0 : index
    %c0_9 = arith.constant 0 : index
    %13 = vector.load %arg5[%c0_7, %c0_8, %c0_9] : memref<2x1x128xf32, #tpu.memory_space<vmem>>, vector<1x1x128xf32>
    %14 = vector.shape_cast %13 : vector<1x1x128xf32> to vector<1x128xf32>
    %15 = arith.addf %12, %14 : vector<1x128xf32>
    %16 = math.tanh %15 : vector<1x128xf32>
    %c0_10 = arith.constant 0 : index
    %c0_11 = arith.constant 0 : index
    %c0_12 = arith.constant 0 : index
    %17 = vector.load %arg9[%c0_10, %c0_11, %c0_12] : memref<2x1x128xf32, #tpu.memory_space<vmem>>, vector<1x1x128xf32>
    %18 = vector.shape_cast %17 : vector<1x1x128xf32> to vector<1x128xf32>
    %19 = vector.shape_cast %16 : vector<1x128xf32> to vector<1x1x128xf32>
    tpu.vector_store %arg9[%c0_10, %c0_11, %c0_12], %19 {strides = array<i32>} : memref<2x1x128xf32, #tpu.memory_space<vmem>>, vector<1x1x128xf32>,
    %c1 = arith.constant 1 : index
    %c0_13 = arith.constant 0 : index
    %c0_14 = arith.constant 0 : index
    %20 = vector.load %arg9[%c1, %c0_13, %c0_14] : memref<2x1x128xf32, #tpu.memory_space<vmem>>, vector<1x1x128xf32>
    %21 = vector.shape_cast %20 : vector<1x1x128xf32> to vector<1x128xf32>
    %22 = tpu.concatenate %16, %21 in 1 : vector<1x128xf32>, vector<1x128xf32> -> vector<1x256xf32>
    %c1_15 = arith.constant 1 : index
    %c0_16 = arith.constant 0 : index
    %c0_17 = arith.constant 0 : index
    %23 = vector.load %arg4[%c1_15, %c0_16, %c0_17] : memref<2x256x128xf32, #tpu.memory_space<vmem>>, vector<1x256x128xf32>
    %24 = vector.shape_cast %23 : vector<1x256x128xf32> to vector<256x128xf32>
    %cst_18 = arith.constant dense<0.000000e+00> : vector<1x128xf32>
    %25 = tpu.matmul %22, %24, %cst_18 {dimension_numbers = #tpu.dot_dimension_numbers<[1], [0], [0], [1], [0, 0, 1, 1], [], []>} : vector<1x256xf32>, vector<256x128xf32>, vector<1x128xf32> -> vector<1x128xf32>
    %c1_19 = arith.constant 1 : index
    %c0_20 = arith.constant 0 : index
    %c0_21 = arith.constant 0 : index
    %26 = vector.load %arg5[%c1_19, %c0_20, %c0_21] : memref<2x1x128xf32, #tpu.memory_space<vmem>>, vector<1x1x128xf32>
    %27 = vector.shape_cast %26 : vector<1x1x128xf32> to vector<1x128xf32>
    %28 = arith.addf %25, %27 : vector<1x128xf32>
    %29 = math.tanh %28 : vector<1x128xf32>
    %c1_22 = arith.constant 1 : index
    %c0_23 = arith.constant 0 : index
    %c0_24 = arith.constant 0 : index
    %30 = vector.load %arg9[%c1_22, %c0_23, %c0_24] : memref<2x1x128xf32, #tpu.memory_space<vmem>>, vector<1x1x128xf32>
    %31 = vector.shape_cast %30 : vector<1x1x128xf32> to vector<1x128xf32>
    %32 = vector.shape_cast %29 : vector<1x128xf32> to vector<1x1x128xf32>
    tpu.vector_store %arg9[%c1_22, %c0_23, %c0_24], %32 {strides = array<i32>} : memref<2x1x128xf32, #tpu.memory_space<vmem>>, vector<1x1x128xf32>,
    %c0_25 = arith.constant 0 : index
    %c0_26 = arith.constant 0 : index
    %33 = vector.load %arg6[%c0_25, %c0_26] : memref<128x128xf32, #tpu.memory_space<vmem>>, vector<128x128xf32>
    %cst_27 = arith.constant dense<0.000000e+00> : vector<1x128xf32>
    %34 = tpu.matmul %29, %33, %cst_27 {dimension_numbers = #tpu.dot_dimension_numbers<[1], [0], [0], [1], [0, 0, 1, 1], [], []>} : vector<1x128xf32>, vector<128x128xf32>, vector<1x128xf32> -> vector<1x128xf32>
    %c0_28 = arith.constant 0 : index
    %c0_29 = arith.constant 0 : index
    %35 = vector.load %arg7[%c0_28, %c0_29] : memref<1x128xf32, #tpu.memory_space<vmem>>, vector<1x128xf32>
    %36 = arith.addf %34, %35 : vector<1x128xf32>
    %cst_30 = arith.constant dense<0xFF800000> : vector<1xf32>
    %37 = vector.multi_reduction <maximumf>, %36, %cst_30 [1] : vector<1x128xf32> to vector<1xf32>
    %38 = vector.shape_cast %37 : vector<1xf32> to vector<1x1xf32>
    %39 = vector.broadcast %38 : vector<1x1xf32> to vector<1x128xf32>
    %40 = arith.subf %36, %39 : vector<1x128xf32>
    %41 = math.exp %40 : vector<1x128xf32>
    %cst_31 = arith.constant dense<0.000000e+00> : vector<1xf32>
    %42 = vector.multi_reduction <add>, %41, %cst_31 [1] : vector<1x128xf32> to vector<1xf32>
    %43 = vector.shape_cast %42 : vector<1xf32> to vector<1x1xf32>
    %44 = math.log %43 : vector<1x1xf32>
    %45 = vector.broadcast %44 : vector<1x1xf32> to vector<1x128xf32>
    %46 = arith.subf %40, %45 : vector<1x128xf32>
    %c0_32 = arith.constant 0 : index
    %c0_33 = arith.constant 0 : index
    %c0_34 = arith.constant 0 : index
    %47 = vector.load %arg8[%c0_32, %c0_33, %c0_34] : memref<1x1x128xf32, #tpu.memory_space<vmem>>, vector<1x1x128xf32>
    %48 = vector.shape_cast %47 : vector<1x1x128xf32> to vector<1x128xf32>
    %49 = vector.shape_cast %46 : vector<1x128xf32> to vector<1x1x128xf32>
    tpu.vector_store %arg8[%c0_32, %c0_33, %c0_34], %49 {strides = array<i32>} : memref<1x1x128xf32, #tpu.memory_space<vmem>>, vector<1x1x128xf32>,
    return
  }
  func.func @transform_0(%arg0: i32, %arg1: memref<8xi32, #tpu.memory_space<smem>>) -> (i32, i32) {
    %c0_i32 = arith.constant 0 : i32
    %c0_i32_0 = arith.constant 0 : i32
    %c0_i32_1 = arith.constant 0 : i32
    return %c0_i32, %c0_i32_0 : i32, i32
  }
  func.func @transform_1(%arg0: i32, %arg1: memref<8xi32, #tpu.memory_space<smem>>) -> (i32, i32, i32) {
    %c0_i32 = arith.constant 0 : i32
    %c0_i32_0 = arith.constant 0 : i32
    %c0_i32_1 = arith.constant 0 : i32
    %c0_i32_2 = arith.constant 0 : i32
    return %c0_i32, %c0_i32_0, %c0_i32_1 : i32, i32, i32
  }
  func.func @transform_2(%arg0: i32, %arg1: memref<8xi32, #tpu.memory_space<smem>>) -> (i32, i32, i32) {
    %c0_i32 = arith.constant 0 : i32
    %c0_i32_0 = arith.constant 0 : i32
    %c0_i32_1 = arith.constant 0 : i32
    %c0_i32_2 = arith.constant 0 : i32
    return %c0_i32, %c0_i32_0, %c0_i32_1 : i32, i32, i32
  }
  func.func @transform_3(%arg0: i32, %arg1: memref<8xi32, #tpu.memory_space<smem>>) -> (i32, i32, i32) {
    %c0_i32 = arith.constant 0 : i32
    %c0_i32_0 = arith.constant 0 : i32
    %c0_i32_1 = arith.constant 0 : i32
    %c0_i32_2 = arith.constant 0 : i32
    return %c0_i32, %c0_i32_0, %c0_i32_1 : i32, i32, i32
  }
  func.func @transform_4(%arg0: i32, %arg1: memref<8xi32, #tpu.memory_space<smem>>) -> (i32, i32) {
    %c0_i32 = arith.constant 0 : i32
    %c0_i32_0 = arith.constant 0 : i32
    %c0_i32_1 = arith.constant 0 : i32
    return %c0_i32, %c0_i32_0 : i32, i32
  }
  func.func @transform_5(%arg0: i32, %arg1: memref<8xi32, #tpu.memory_space<smem>>) -> (i32, i32) {
    %c0_i32 = arith.constant 0 : i32
    %c0_i32_0 = arith.constant 0 : i32
    %c0_i32_1 = arith.constant 0 : i32
    return %c0_i32, %c0_i32_0 : i32, i32
  }
  func.func @transform_6(%arg0: i32, %arg1: memref<8xi32, #tpu.memory_space<smem>>) -> (i32, i32, i32) {
    %c0_i32 = arith.constant 0 : i32
    %c0_i32_0 = arith.constant 0 : i32
    %c0_i32_1 = arith.constant 0 : i32
    return %arg0, %c0_i32, %c0_i32_0 : i32, i32, i32
  }
  func.func @transform_7(%arg0: i32, %arg1: memref<8xi32, #tpu.memory_space<smem>>) -> (i32, i32, i32) {
    %c0_i32 = arith.constant 0 : i32
    %c0_i32_0 = arith.constant 0 : i32
    %c0_i32_1 = arith.constant 0 : i32
    %c0_i32_2 = arith.constant 0 : i32
    return %c0_i32, %c0_i32_0, %c0_i32_1 : i32, i32, i32
  }
}

</mosaic_0001>

<bundles_post_ra>
// kernel: tpu_custom_call.1
= control target key start
LH: loop header
LB: loop body
LE: loop exit
PB: predicated region body
PF: predicated region fallthrough
CT: control target
= control target key end

     0   :  { %s1033_s30 = smov [#allocation3]   ;;  %s1255_s0 = inlined_call_operand.hbm [shape: s32[8], index: 0, kind: input, shape index: {}]   ;;  %s1256_s1 = inlined_call_operand.hbm [shape: f32[64,128], index: 1, kind: input, shape index: {}]   ;;  %s1257_s2 = inlined_call_operand.hbm [shape: f32[2,1,128], index: 2, kind: input, shape index: {}]   ;;  %s1258_s3 = inlined_call_operand.hbm [shape: f32[2,256,128], index: 3, kind: input, shape index: {}]   ;;  %s1259_s4 = inlined_call_operand.vmem [shape: f32[2,1,128], index: 4, kind: input, shape index: {}]   ;;  %s1260_s5 = inlined_call_operand.hbm [shape: f32[128,128], index: 5, kind: input, shape index: {}]   ;;  %s1261_s6 = inlined_call_operand.vmem [shape: f32[1,128], index: 6, kind: input, shape index: {}]   ;;  %s1262_s7 = inlined_call_operand.hbm [shape: f32[8,1,128], index: 7, kind: output, shape index: {0}]   ;;  %s1263_s8 = inlined_call_operand.hbm [shape: f32[2,1,128], index: 8, kind: output, shape index: {1}]  }
   0x1   :  { %1265 = sst [smem:[#allocation23_spill]] %s1256_s1  ;;  %s15_s29 = sshll.u32 %s1255_s0, 4  ;;  %s16_s29 = int_to_ptr.hbm [resolvable:$true] %s15_s29 }
   0x2   :  { %1266 = sst [smem:[#allocation24_spill]] %s1257_s2 }
   0x3   :  { %18 = dma.hbm_to_smem %s16_s29, 16, %s1033_s30, [#allocation2] }
   0x4   :  { %995 = dma.done.wait [#allocation2], 16 }
   0x5   :  { %996 = vsyncadd [#allocation2], 4294967280 }
   0x6   :  { %21 = sfence }
   0x7   :  { %22 = vsyncpa [#allocation5], 0 }
   0x8   :  { %23 = vsyncpa [#allocation8], 0 }
   0x9   :  { %24 = vsyncpa [#allocation11], 0 }
   0xa   :  { %25 = vsyncpa [#allocation6], 0 }
   0xb   :  { %27 = vsyncpa [#allocation6 + $0x1], 0 }
   0xc   :  { %28 = vsyncpa [#allocation14], 0  ;;  %s1093_s9 = smov 0   ;;  %s1095_s10 = smov 0  }
   0xd   :  { %s1097_s11 = smov 0   ;;  %s1099_s12 = smov 0  }
   0xe LB: > { %1267 = sst [smem:[#allocation21_spill]] %s1027_s11  ;;  %s1114_s0 = sadd.s32 4294967295, %s1031_s12   ;;  %s1031_s12 = sphi %s1099_s12, %s1279_s12   ;;  %s1027_s11 = sphi %s1097_s11, %s1276_s11   ;;  %s1023_s10 = sphi %s1095_s10, %s1278_s10   ;;  %s1019_s9 = sphi %s1093_s9, %s1277_s9  }
   0xf   : > { %s672_s13 = sadd.s32 4294967294, %s1031_s12   ;;  %s1118_s14 = sadd.s32 1, %s1031_s12  }
  0x10   : > { %s167_s15 = sadd.s32 1, %s1027_s11  ;;  %s164_s16 = ssub.s32 %s1031_s12, %s1118_s14 }
  0x11   : > { %p177_p0 = scmp.ne.s32.totalorder %s1027_s11, %s1023_s10  ;;  %p165_p1 = scmp.eq.s32.totalorder %s164_s16, 0 }
  0x12   : > { %p178_p2 = scmp.eq.s32.totalorder %s1114_s0, 7  ;;  %p183_p3 = scmp.ne.s32.totalorder %s1023_s10, %s1019_s9 }
  0x13   : > { %p184_p4 = scmp.eq.s32.totalorder %s672_s13, 7  ;;  %p673_p7 = scmp.ge.s32.totalorder %s1031_s12, 1 }
  0x14   : > { %s1129_s17 = scalar_select %p165_p1, %s1027_s11, %s167_s15  }
  0x15   : > { %p1133_p5 = por %p178_p2, %p177_p0  ;;  %p1137_p6 = por %p184_p4, %p183_p3 }
  0x16   : > { %1268 = sst [smem:[#allocation22_spill]] %s1129_s17  ;;  %p212_p8 = scmp.lt.s32.totalorder %s1031_s12, 9 }
  0x17   : > { %p674_p9 = scmp.ne.s32.totalorder %s1114_s0, 0  ;;  %p728_p10 = scmp.eq.s32.totalorder %s1114_s0, 0 }
  0x18   : > { %p1145_p11 = pnand %p673_p7, %p212_p8  ;;  %s1272_s2 = sld [smem:[#allocation24_spill]] }
  0x19   : > { %s1034_s24 = smov [#allocation7]   ;;  %s1274_s1 = sld [smem:[#allocation23_spill]] }
  0x1a   : > { %p711_p12 = pneg %p1145_p11  ;;  %s239_s25 = sshll.u32 %s1034_s24, 4  ;;  %s240_s25 = int_to_ptr.vmem [resolvable:$true] %s239_s25 }
  0x1b   : > { %s1035_s30 = smov 16   ;;  %s1036_s13 = smov 1  }
  0x1c   : > { %p1156_p13 = pnand %p728_p10, %p711_p12  ;;  %s1037_s15 = smov [#allocation4]  }
  0x1d   : > { %s225_s16 = sshll.u32 %s1037_s15, 4  ;;  %s1038_s21 = smov 128   ;;  %s226_s16 = int_to_ptr.vmem [resolvable:$true] %s225_s16 }
  0x1e   : > { %s237_s23 = sshll.u32 %s1272_s2, 4  ;;  %s1039_s22 = smov 8   ;;  %s238_s23 = int_to_ptr.hbm [resolvable:$true] %s237_s23 }
  0x1f   : > { %s223_s29 = sshll.u32 %s1274_s1, 4  ;;  %s251_s27 = sshll.u32 %s1258_s3, 4  ;;  %s224_s29 = int_to_ptr.hbm [resolvable:$true] %s223_s29  ;;  %s252_s27 = int_to_ptr.hbm [resolvable:$true] %s251_s27 }
  0x20   : > { %717 = dma.hbm_to_vmem [thread:$0]  (!%p1156_p13), %s238_s23, 32, %s240_s25, [#allocation8], %s1035_s30, %s1035_s30, %s1036_s13  }
  0x21   : > { %714 = dma.hbm_to_vmem [thread:$0]  (!%p1156_p13), %s224_s29, 1024, %s226_s16, [#allocation5], %s1038_s21, %s1038_s21, %s1039_s22  }
  0x22   : > { %s1040_s28 = smov [#allocation9]   ;;  %s268_s23 = sshll.u32 %s1260_s5, 4  ;;  %s269_s23 = int_to_ptr.hbm [resolvable:$true] %s268_s23 }
  0x23   : > { %s253_s1 = sshll.u32 %s1040_s28, 4  ;;  %s1041_s25 = smov [#allocation10]   ;;  %s254_s1 = int_to_ptr.vmem [resolvable:$true] %s253_s1 }
  0x24   : > { %720 = dma.hbm_to_vmem [thread:$0]  (!%p1156_p13), %s252_s27, 8192, %s254_s1, [#allocation8], %s1038_s21, %s1038_s21, %s1039_s22  }
  0x25   : > { %s270_s30 = sshll.u32 %s1041_s25, 4  ;;  %289 = sbr.rel (%p1145_p11) target bundleno = 755 (0x2f3), region = 44  ;;  %s271_s30 = int_to_ptr.vmem [resolvable:$true] %s270_s30 }
  0x26   : > { %723 = dma.hbm_to_vmem [thread:$0]  (!%p1156_p13), %s269_s23, 2048, %s271_s30, [#allocation11], %s1038_s21, %s1038_s21, %s1039_s22  }
  0x2a   : > { %998 = dma.done.wait (%p728_p10), [#allocation5], 1024  }
  0x2b   : > { %1000 = vsyncadd (%p728_p10), [#allocation5], 4294966272 }
  0x2c   : > { %1002 = dma.done.wait (%p728_p10), [#allocation8], 8224  }
  0x2d   : > { %1004 = vsyncadd (%p728_p10), [#allocation8], 4294959072 }
  0x2e   : > { %1006 = dma.done.wait (%p728_p10), [#allocation11], 2048  }
  0x2f   : > { %1008 = vsyncadd (%p728_p10), [#allocation11], 4294965248  ;;  %s327_s1 = sand.u32 1, %s1023_s10   ;;  %334 = sbr.rel (%p674_p9) target bundleno = 54 (0x36), region = 64 }
  0x30   : > { %s1194_s2 = scalar_lea.vmem [#allocation12], %s327_s1 }
  0x34   : > { %v335_v0 = vld [vmem:[#allocation7] sm:$0x3]  }
  0x35   : > { %337 = vst [vmem:[#allocation13] sm:$0x3] %v335_v0  }
  0x36 PF: > { %v358_v1 = vld [vmem:[#allocation9 + $0x78] sm:$0xff]  ;;  %v357_v2 = vld [vmem:[#allocation9 + $0x70] sm:$0xff]  ;;  %v356_v5 = vld [vmem:[#allocation9 + $0x68] sm:$0xff]  ;;  %s1199_s11 = sld [smem:[#allocation3 + %s1114_s0]]  ;;  %vm534_vm0 = vcmask 1040384   ;;  %s1042_s21 = smov [#allocation13]  }
  0x37   : > { %v374_v3 = vld [vmem:[#allocation9 + $0xf8] sm:$0xff]  ;;  %376 = vmatpush.msra.mxu0 %v358_v1  ;;  %v373_v4 = vld [vmem:[#allocation9 + $0xf0] sm:$0xff]  ;;  %v372_v6 = vld [vmem:[#allocation9 + $0xe8] sm:$0xff]  ;;  %s570_s22 = sshll.u32 %s1042_s21, 4  ;;  %s572_s28 = sshll.u32 %s1263_s8, 4  ;;  %s571_s22 = int_to_ptr.vmem [resolvable:$true] %s570_s22  ;;  %s573_s28 = int_to_ptr.hbm [resolvable:$true] %s572_s28 }
  0x38   : > { %396 = vmatpush.msra.mxu1 %v374_v3  ;;  %v355_v7 = vld [vmem:[#allocation9 + $0x60] sm:$0xff]  ;;  %v354_v9 = vld [vmem:[#allocation9 + $0x58] sm:$0xff]  ;;  %v353_v11 = vld [vmem:[#allocation9 + $0x50] sm:$0xff]  ;;  %s1043_s23 = smov 16   ;;  %s1044_s25 = smov 1  }
  0x39   : > { %377 = vmatpush.msra.mxu0 %v357_v2  ;;  %v371_v8 = vld [vmem:[#allocation9 + $0xe0] sm:$0xff]  ;;  %v370_v10 = vld [vmem:[#allocation9 + $0xd8] sm:$0xff]  ;;  %v369_v12 = vld [vmem:[#allocation9 + $0xd0] sm:$0xff]  ;;  %s559_s20 = sshll.u32 %s1194_s2, 4  ;;  %s549_s29 = scalar_lea.sflag [#allocation6], %s327_s1  ;;  %s560_s20 = int_to_ptr.vmem [resolvable:$true] %s559_s20 }
  0x3a   : > { %397 = vmatpush.msra.mxu1 %v373_v4  ;;  %v352_v13 = vld [vmem:[#allocation9 + $0x48] sm:$0xff]  ;;  %v436_v15 = vld [vmem:[#allocation9 + $0x178] sm:$0xff]  ;;  %v435_v16 = vld [vmem:[#allocation9 + $0x170] sm:$0xff] }
  0x3b   : > { %378 = vmatpush.msra.mxu0 %v356_v5  ;;  %v368_v14 = vld [vmem:[#allocation9 + $0xc8] sm:$0xff]  ;;  %v351_v17 = vld [vmem:[#allocation9 + $0x40] sm:$0xff]  ;;  %455 = vmatpush.msra.mxu2 %v436_v15  ;;  %v452_v19 = vld [vmem:[#allocation9 + $0x1f8] sm:$0xff] }
  0x3c   : > { %398 = vmatpush.msra.mxu1 %v372_v6  ;;  %v367_v18 = vld [vmem:[#allocation9 + $0xc0] sm:$0xff]  ;;  %v434_v20 = vld [vmem:[#allocation9 + $0x168] sm:$0xff]  ;;  %v451_v21 = vld [vmem:[#allocation9 + $0x1f0] sm:$0xff]  ;;  %475 = vmatpush.msra.mxu3 %v452_v19  ;;  %s340_s17 = scalar_lea.vmem [#allocation4], %s1199_s11 }
  0x3d   : > { %379 = vmatpush.msra.mxu0 %v355_v7  ;;  %v350_v22 = vld [vmem:[#allocation9 + $0x38] sm:$0xff]  ;;  %456 = vmatpush.msra.mxu2 %v435_v16  ;;  %v433_v24 = vld [vmem:[#allocation9 + $0x160] sm:$0xff]  ;;  %v450_v25 = vld [vmem:[#allocation9 + $0x1e8] sm:$0xff] }
  0x3e   : > { %399 = vmatpush.msra.mxu1 %v371_v8  ;;  %v366_v23 = vld [vmem:[#allocation9 + $0xb8] sm:$0xff]  ;;  %v349_v26 = vld [vmem:[#allocation9 + $0x30] sm:$0xff]  ;;  %476 = vmatpush.msra.mxu3 %v451_v21  ;;  %v449_v29 = vld [vmem:[#allocation9 + $0x1e0] sm:$0xff] }
  0x3f   : > { %380 = vmatpush.msra.mxu0 %v354_v9  ;;  %v365_v27 = vld [vmem:[#allocation9 + $0xb0] sm:$0xff]  ;;  %457 = vmatpush.msra.mxu2 %v434_v20  ;;  %v432_v28 = vld [vmem:[#allocation9 + $0x158] sm:$0xff]  ;;  %v348_v30 = vld [vmem:[#allocation9 + $0x28] sm:$0xff] }
  0x40   : > { %400 = vmatpush.msra.mxu1 %v370_v10  ;;  %v364_v31 = vld [vmem:[#allocation9 + $0xa8] sm:$0xff]  ;;  %477 = vmatpush.msra.mxu3 %v450_v25  ;;  %v431_v32 = vld [vmem:[#allocation9 + $0x150] sm:$0xff]  ;;  %v448_v33 = vld [vmem:[#allocation9 + $0x1d8] sm:$0xff] }
  0x41   : > { %381 = vmatpush.msra.mxu0 %v353_v11  ;;  %458 = vmatpush.msra.mxu2 %v433_v24  ;;  %v347_v34 = vld [vmem:[#allocation9 + $0x20] sm:$0xff]  ;;  %v430_v36 = vld [vmem:[#allocation9 + $0x148] sm:$0xff]  ;;  %v447_v37 = vld [vmem:[#allocation9 + $0x1d0] sm:$0xff] }
  0x42   : > { %401 = vmatpush.msra.mxu1 %v369_v12  ;;  %v363_v35 = vld [vmem:[#allocation9 + $0xa0] sm:$0xff]  ;;  %478 = vmatpush.msra.mxu3 %v449_v29  ;;  %v346_v38 = vld [vmem:[#allocation9 + $0x18] sm:$0xff]  ;;  %v446_v41 = vld [vmem:[#allocation9 + $0x1c8] sm:$0xff] }
  0x43   : > { %382 = vmatpush.msra.mxu0 %v352_v13  ;;  %459 = vmatpush.msra.mxu2 %v432_v28  ;;  %v362_v39 = vld [vmem:[#allocation9 + $0x98] sm:$0xff]  ;;  %v429_v40 = vld [vmem:[#allocation9 + $0x140] sm:$0xff]  ;;  %v345_v42 = vld [vmem:[#allocation9 + $0x10] sm:$0xff] }
  0x44   : > { %402 = vmatpush.msra.mxu1 %v368_v14  ;;  %479 = vmatpush.msra.mxu3 %v448_v33  ;;  %v361_v43 = vld [vmem:[#allocation9 + $0x90] sm:$0xff]  ;;  %v428_v44 = vld [vmem:[#allocation9 + $0x138] sm:$0xff]  ;;  %v445_v45 = vld [vmem:[#allocation9 + $0x1c0] sm:$0xff] }
  0x45   : > { %383 = vmatpush.msra.mxu0 %v351_v17  ;;  %460 = vmatpush.msra.mxu2 %v431_v32  ;;  %v344_v46 = vld [vmem:[#allocation9 + $0x8] sm:$0xff]  ;;  %v427_v48 = vld [vmem:[#allocation9 + $0x130] sm:$0xff]  ;;  %v444_v49 = vld [vmem:[#allocation9 + $0x1b8] sm:$0xff] }
  0x46   : > { %403 = vmatpush.msra.mxu1 %v367_v18  ;;  %480 = vmatpush.msra.mxu3 %v447_v37  ;;  %v360_v47 = vld [vmem:[#allocation9 + $0x88] sm:$0xff]  ;;  %v343_v50 = vld [vmem:[#allocation9] sm:$0xff]  ;;  %v341_v52 = vld [vmem:[%s340_s17] sm:$0x1]  ;;  %s557_s17 = scalar_lea.hbm %s1262_s7, %s1114_s0 }
  0x47   : > { %384 = vmatpush.msra.mxu0 %v350_v22  ;;  %461 = vmatpush.msra.mxu2 %v430_v36  ;;  %v359_v51 = vld [vmem:[#allocation9 + $0x80] sm:$0xff]  ;;  %v426_v54 = vld [vmem:[#allocation9 + $0x128] sm:$0xff]  ;;  %v443_v55 = vld [vmem:[#allocation9 + $0x1b0] sm:$0xff]  ;;  %s561_s26 = sshll.u32 %s557_s17, 4  ;;  %s562_s26 = int_to_ptr.hbm [resolvable:$true] %s561_s26 }
  0x48   : > { %404 = vmatpush.msra.mxu1 %v366_v23  ;;  %481 = vmatpush.msra.mxu3 %v446_v41  ;;  %v342_v53 = vld [vmem:[#allocation13] sm:$0x1]  ;;  %v442_v57 = vld [vmem:[#allocation9 + $0x1a8] sm:$0xff]  ;;  %v424_v58 = vld [vmem:[#allocation9 + $0x118] sm:$0xff]  ;;  %s965_s13 = sshra.s32 %s562_s26, 4  ;;  %s966_s13 = int_to_ptr.hbm [resolvable:$true] %s965_s13 }
  0x49   : > { %385 = vmatpush.msra.mxu0 %v349_v26  ;;  %462 = vmatpush.msra.mxu2 %v429_v40  ;;  %v425_v56 = vld [vmem:[#allocation9 + $0x120] sm:$0xff]  ;;  %v423_v60 = vld [vmem:[#allocation9 + $0x110] sm:$0xff]  ;;  %v440_v61 = vld [vmem:[#allocation9 + $0x198] sm:$0xff]  ;;  %s967_s15 = scalar_lea.hbm %s966_s13, 1  ;;  %p972_p4 = scmp.lt.s32.totalorder %s966_s13, %s1262_s7 }
  0x4a   : > { %405 = vmatpush.msra.mxu1 %v365_v27  ;;  %482 = vmatpush.msra.mxu3 %v445_v45  ;;  %v441_v59 = vld [vmem:[#allocation9 + $0x1a0] sm:$0xff]  ;;  %v422_v62 = vld [vmem:[#allocation9 + $0x108] sm:$0xff]  ;;  %v439_v63 = vld [vmem:[#allocation9 + $0x190] sm:$0xff]  ;;  %p968_p0 = scmp.ne.s32.totalorder %s966_s13, %s967_s15 }
  0x4b   : > { %386 = vmatpush.msra.mxu0 %v348_v30  ;;  %463 = vmatpush.msra.mxu2 %v428_v44  ;;  %v421_v0 = vld [vmem:[#allocation9 + $0x100] sm:$0xff]  ;;  %v438_v1 = vld [vmem:[#allocation9 + $0x188] sm:$0xff]  ;;  %v512_v4 = vld [vmem:[#allocation10 + $0x78] sm:$0xff] }
  0x4c   : > { %406 = vmatpush.msra.mxu1 %v364_v31  ;;  %483 = vmatpush.msra.mxu3 %v444_v49  ;;  %v437_v2 = vld [vmem:[#allocation9 + $0x180] sm:$0xff]  ;;  %v511_v5 = vld [vmem:[#allocation10 + $0x70] sm:$0xff]  ;;  %v510_v6 = vld [vmem:[#allocation10 + $0x68] sm:$0xff]  ;;  %p969_p1 = pnand %p968_p0, %p1133_p5 }
  0x4d   : > { %387 = vmatpush.msra.mxu0 %v347_v34  ;;  %464 = vmatpush.msra.mxu2 %v427_v48  ;;  %v419_v3 = vld [vmem:[#allocation13 + $0x1] sm:$0x1]  ;;  %v508_v8 = vld [vmem:[#allocation10 + $0x58] sm:$0xff]  ;;  %v507_v9 = vld [vmem:[#allocation10 + $0x50] sm:$0xff] }
  0x4e   : > { %407 = vmatpush.msra.mxu1 %v363_v35  ;;  %484 = vmatpush.msra.mxu3 %v443_v55  ;;  %v509_v7 = vld [vmem:[#allocation10 + $0x60] sm:$0xff]  ;;  %v506_v10 = vld [vmem:[#allocation10 + $0x48] sm:$0xff]  ;;  %v504_v12 = vld [vmem:[#allocation10 + $0x38] sm:$0xff]  ;;  %p970_p3 = pneg %p969_p1 }
  0x4f   : > { %388 = vmatpush.msra.mxu0 %v346_v38  ;;  %465 = vmatpush.msra.mxu2 %v426_v54  ;;  %v505_v11 = vld [vmem:[#allocation10 + $0x40] sm:$0xff]  ;;  %v503_v13 = vld [vmem:[#allocation10 + $0x30] sm:$0xff]  ;;  %v375_v14 = vld [vmem:[%s1259_s4] sm:$0x1] }
  0x50   : > { %408 = vmatpush.msra.mxu1 %v362_v39  ;;  %485 = vmatpush.msra.mxu3 %v442_v57  ;;  %v502_v20 = vld [vmem:[#allocation10 + $0x28] sm:$0xff]  ;;  %v501_v21 = vld [vmem:[#allocation10 + $0x20] sm:$0xff]  ;;  %v500_v22 = vld [vmem:[#allocation10 + $0x18] sm:$0xff] }
  0x51   : > { %389 = vmatpush.msra.mxu0 %v345_v42  ;;  %466 = vmatpush.msra.mxu2 %v425_v56  ;;  %v499_v23 = vld [vmem:[#allocation10 + $0x10] sm:$0xff]  ;;  %v498_v24 = vld [vmem:[#allocation10 + $0x8] sm:$0xff]  ;;  %v497_v25 = vld [vmem:[#allocation10] sm:$0xff] }
  0x52   : > { %409 = vmatpush.msra.mxu1 %v361_v43  ;;  %486 = vmatpush.msra.mxu3 %v441_v59  ;;  %v684_v26 = vld [vmem:[%s1259_s4 + $0x1] sm:$0x1]  ;;  %v513_v32 = vld [vmem:[%s1261_s6] sm:$0x1] }
  0x53   : > { %390 = vmatpush.msra.mxu0 %v344_v46  ;;  %467 = vmatpush.msra.mxu2 %v424_v58 }
  0x54   : > { %410 = vmatpush.msra.mxu1 %v360_v47  ;;  %487 = vmatpush.msra.mxu3 %v440_v61 }
  0x55   : > { %391 = vmatpush.msra.mxu0 %v343_v50  ;;  %468 = vmatpush.msra.mxu2 %v423_v60 }
  0x56   : > { %411 = vmatpush.msra.mxu1 %v359_v51  ;;  %392 = vmatmul.f32.vlgmr.msra.gmra.mxu0 %v341_v52 }
  0x57   : > { %412 = vmatmul.f32.vlgmr.msra.gmra.mxu1 %v342_v53  ;;  %469 = vmatpush.msra.mxu2 %v422_v62 }
  0x58   : > { %488 = vmatpush.msra.mxu3 %v439_v63  ;;  %514 = vmatpush.msrb.mxu0 %v512_v4 }
  0x59   : > { %470 = vmatpush.msra.mxu2 %v421_v0 }
  0x5a   : > { %489 = vmatpush.msra.mxu3 %v438_v1  ;;  %515 = vmatpush.msrb.mxu0 %v511_v5 }
  0x5c   : > { %490 = vmatpush.msra.mxu3 %v437_v2  ;;  %516 = vmatpush.msrb.mxu0 %v510_v6 }
  0x5d   : > { %491 = vmatmul.f32.vlgmr.msra.gmra.mxu3 %v419_v3 }
  0x5e   : > { %517 = vmatpush.msrb.mxu0 %v509_v7 }
  0x60   : > { %518 = vmatpush.msrb.mxu0 %v508_v8 }
  0x62   : > { %519 = vmatpush.msrb.mxu0 %v507_v9 }
  0x64   : > { %520 = vmatpush.msrb.mxu0 %v506_v10 }
  0x66   : > { %521 = vmatpush.msrb.mxu0 %v505_v11 }
  0x68   : > { %522 = vmatpush.msrb.mxu0 %v504_v12 }
  0x6a   : > { %523 = vmatpush.msrb.mxu0 %v503_v13 }
  0x6c   : > { %524 = vmatpush.msrb.mxu0 %v502_v20 }
  0x6e   : > { %525 = vmatpush.msrb.mxu0 %v501_v21 }
  0x70   : > { %526 = vmatpush.msrb.mxu0 %v500_v22 }
  0x72   : > { %527 = vmatpush.msrb.mxu0 %v499_v23 }
  0x74   : > { %528 = vmatpush.msrb.mxu0 %v498_v24 }
  0x76   : > { %529 = vmatpush.msrb.mxu0 %v497_v25 }
  0xd3   : > { %v393_v15 = vpop.f32.mrf.mxu0 }
  0xd4   : > { %v413_v16 = vpop.f32.mrf.mxu1  ;;  %v394_v17 = vadd.f32 %v393_v15, %v375_v14 }
  0xd6   : > { %v414_v18 = vadd.f32 %v413_v16, %v394_v17 }
  0xd8   : > { %783 = vtanh.f32 %v414_v18 }
  0xde   : > { %v784_v19 = vpop.eup %783 }
  0xdf   : > { %417 = vst [vmem:[#allocation13] sm:$0x1] %v784_v19  ;;  %471 = vmatmul.f32.vlgmr.msra.gmra.mxu2 %v784_v19 }
  0xe0   : > { %v492_v28 = vpop.f32.mrf.mxu3 }
 0x162   : > { %v472_v27 = vpop.f32.mrf.mxu2 }
 0x163   : > { %v473_v29 = vadd.f32 %v684_v26, %v472_v27 }
 0x165   : > { %v493_v30 = vadd.f32 %v492_v28, %v473_v29 }
 0x167   : > { %785 = vtanh.f32 %v493_v30 }
 0x16d   : > { %v786_v31 = vpop.eup %785 }
 0x16e   : > { %496 = vst [vmem:[#allocation13 + $0x1] sm:$0x1] %v786_v31  ;;  %530 = vmatmul.f32.vlgmr.msrb.gmra.mxu0 %v786_v31 }
 0x16f   : > { %707 = dma.vmem_to_hbm [thread:$0]  (%p178_p2), %s571_s22, 32, %s573_s28, [#allocation14], %s1043_s23, %s1043_s23, %s1044_s25  }
 0x170   : > { %s971_s22 = scalar_lea.hbm %s1262_s7, 8 }
 0x171   : > { %p973_p7 = scmp.lt.s32.totalorder %s971_s22, %s967_s15 }
 0x173   : > { %p974_p8 = por %p973_p7, %p972_p4 }
 0x175   : > { %p975_p9 = pnand %p974_p8, %p970_p3 }
 0x1eb   : > { %v531_v33 = vpop.f32.mrf.mxu0 }
 0x1ec   : > { %v532_v34 = vadd.f32 %v531_v33, %v513_v32 }
 0x1ee   : > { %v535_v35 = vsel %vm534_vm0, %v532_v34, -inf }
 0x1ef   : > { %536 = vmax.xlane.f32.xlu0 %v535_v35 }
 0x262   : > { %v537_v36 = vpop.xlane.xlu0 %536 }
 0x263   : > { %v538_v37 = vsub.f32 %v532_v34, %v537_v36 }
 0x265   : > { %v539_v38 = vmul.f32 1.442695, %v538_v37 }
 0x267   : > { %787 = vpow2.f32 %v539_v38 }
 0x26d   : > { %v788_v39 = vpop.eup %787 }
 0x26e   : > { %v541_v40 = vsel %vm534_vm0, %v788_v39, 0.0 }
 0x26f   : > { %542 = vadd.xlane.f32.xlu0 %v541_v40 }
 0x2e2   : > { %v543_v41 = vpop.xlane.xlu0 %542 }
 0x2e3   : > { %789 = vlog2.f32 %v543_v41 }
 0x2e9   : > { %v790_v42 = vpop.eup %789 }
 0x2ea   : > { %v545_v43 = vmul.f32 0.6931472, %v790_v42 }
 0x2ec   : > { %v546_v44 = vsub.f32 %v538_v37, %v545_v43 }
 0x2ee   : > { %547 = vst [vmem:[%s1194_s2] sm:$0x1] %v546_v44 }
 0x2ef   : > { %978 = shalt.err (!%p975_p9)
}
 0x2f0   : > { %705 = dma.vmem_to_hbm [thread:$0]  (%p1133_p5), %s560_s20, 16, %s562_s26, %s549_s29  }
 0x2f1   : > { %1010 = dma.done.wait (%p178_p2), [#allocation14], 32  }
 0x2f2   : > { %1012 = vsyncadd (%p178_p2), [#allocation14], 4294967264 }
 0x2f3 PF: > { %p738_p10 = scmp.ge.s32.totalorder %s1031_s12, 2  ;;  %s592_s1 = sand.u32 1, %s1019_s9  }
 0x2f4   : > { %s593_s2 = scalar_lea.sflag [#allocation6], %s592_s1 }
 0x2f5   : > { %p725_p11 = pnand %p738_p10, %p1137_p6 }
 0x2f7   : > { %p726_p12 = pneg %p725_p11 }
 0x2f9   : > { %1014 = dma.done.wait (%p726_p12), %s593_s2, 16  }
 0x2fa   : > { %1016 = vsyncadd (%p726_p12), %s593_s2, 4294967280  ;;  %s1275_s18 = sld [smem:[#allocation21_spill]]  ;;  %p31_p5 = scmp.ge.s32.totalorder %s1118_s14, 10  }
 0x2fb   : > { %s1276_s11 = sld [smem:[#allocation22_spill]]  ;;  %s1277_s9 = smov %s1023_s10 }
 0x2fc   : > { %s1279_s12 = smov %s1118_s14  ;;  %33 = sbr.rel (!%p31_p5) target bundleno = 14 (0xe), region = 109 }
 0x300   : > { %s1278_s10 = smov %s1275_s18 }
 0x301   :  { %598 = vsyncpa [#allocation5], 1 }
 0x302   :  { %600 = vsyncpa [#allocation5 + $0x1], 1 }
 0x303   :  { %601 = vsyncpa [#allocation8], 1 }
 0x304   :  { %602 = vsyncpa [#allocation11], 1 }
 0x305   :  { %603 = vsyncpa [#allocation6], 1 }
 0x306   :  { %605 = vsyncpa [#allocation6 + $0x1], 1 }
 0x307   :  { %606 = vsyncpa [#allocation14], 1 }

</bundles_post_ra>
